<compile_context>
chip_gen: v7x
topology: tpu7x:2x2x1
jax: 0.10.0
libtpu: 0.0.40
codegen_flags: <defaults>
</compile_context>

<pallas_src>
import jax
import jax.numpy as jnp
from jax.experimental import pallas as pl
from jax.experimental.pallas import tpu as pltpu


# ---------------------------------------------------------------------------
# one_hot=True path:  y = labels @ W + b    (nn.Linear(label_dim, latent_dim))
# ---------------------------------------------------------------------------
def _linear_kernel(x_ref, w_ref, b_ref, o_ref):
    # x: (tm, label_dim), w: (label_dim, latent_dim), b: (1, latent_dim)
    acc = jnp.dot(x_ref[...], w_ref[...], preferred_element_type=jnp.float32)
    o_ref[...] = (acc + b_ref[...]).astype(o_ref.dtype)


def label_mapping_linear(labels, weight, bias, *, block_b=256):
    """labels: (B, label_dim) f32; weight: (label_dim, latent_dim); bias: (latent_dim,)."""
    B, label_dim = labels.shape
    latent_dim = weight.shape[1]
    bias2d = bias.reshape(1, latent_dim)

    # Single block for small B; tile the batch (multiple of 8) when B grows so
    # labels/output DMAs pipeline against the matmul.
    tm = B if B <= block_b else block_b
    grid = (pl.cdiv(B, tm),)

    return pl.pallas_call(
        _linear_kernel,
        out_shape=jax.ShapeDtypeStruct((B, latent_dim), labels.dtype),
        grid=grid,
        in_specs=[
            pl.BlockSpec((tm, label_dim), lambda i: (i, 0)),
            pl.BlockSpec((label_dim, latent_dim), lambda i: (0, 0)),
            pl.BlockSpec((1, latent_dim), lambda i: (0, 0)),
        ],
        out_specs=pl.BlockSpec((tm, latent_dim), lambda i: (i, 0)),
        # Batch axis is independent -> shard across the 2 TensorCores on v7x;
        # harmless (1 TC) on v5e/v6e.
        compiler_params=pltpu.CompilerParams(dimension_semantics=("parallel",)),
    )(labels, weight, bias2d)


# ---------------------------------------------------------------------------
# one_hot=False path:  y[i] = table[ids[i]]   (nn.Embedding(num_classes, latent_dim))
#
# Scalar-prefetch gather: ids sit in SMEM and drive the table index_map, so
# only the B referenced rows are DMA'd HBM->VMEM (never the full table), and
# each grid step issues one lane-dense (1, latent_dim) vector store.
# ---------------------------------------------------------------------------
def _gather_row_kernel(ids_ref, row_ref, o_ref):
    del ids_ref  # only consumed by the index_maps
    o_ref[...] = row_ref[...]


def label_mapping_embedding(ids, table):
    """ids: (B,) int; table: (num_classes, latent_dim) f32  ->  (B, latent_dim)."""
    B = ids.shape[0]
    num_classes, latent_dim = table.shape
    # VMEM/DMA reads are not bounds-checked: clamp defensively.
    ids = jnp.clip(ids.astype(jnp.int32), 0, num_classes - 1)

    grid_spec = pltpu.PrefetchScalarGridSpec(
        num_scalar_prefetch=1,
        grid=(B,),
        in_specs=[
            # Gather exactly the referenced table row for grid step i.
            pl.BlockSpec((1, latent_dim), lambda i, ids_ref: (ids_ref[i], 0)),
        ],
        out_specs=pl.BlockSpec((1, latent_dim), lambda i, ids_ref: (i, 0)),
    )
    return pl.pallas_call(
        _gather_row_kernel,
        out_shape=jax.ShapeDtypeStruct((B, latent_dim), table.dtype),
        grid_spec=grid_spec,
        compiler_params=pltpu.CompilerParams(dimension_semantics=("arbitrary",)),
    )(ids, table)


# ---------------------------------------------------------------------------
# Fast path for one_hot=True when the caller holds integer class ids:
#   one_hot(ids) @ W + b  ==  W[ids, :] + b   -> reuse the gather, add bias.
# ---------------------------------------------------------------------------
def _gather_row_bias_kernel(ids_ref, row_ref, b_ref, o_ref):
    del ids_ref
    o_ref[...] = row_ref[...] + b_ref[...]


def label_mapping_linear_from_ids(ids, weight, bias):
    """ids: (B,) int; weight: (label_dim, latent_dim); bias: (latent_dim,)."""
    B = ids.shape[0]
    label_dim, latent_dim = weight.shape
    ids = jnp.clip(ids.astype(jnp.int32), 0, label_dim - 1)
    bias2d = bias.reshape(1, latent_dim)

    grid_spec = pltpu.PrefetchScalarGridSpec(
        num_scalar_prefetch=1,
        grid=(B,),
        in_specs=[
            pl.BlockSpec((1, latent_dim), lambda i, ids_ref: (ids_ref[i], 0)),
            pl.BlockSpec((1, latent_dim), lambda i, ids_ref: (0, 0)),
        ],
        out_specs=pl.BlockSpec((1, latent_dim), lambda i, ids_ref: (i, 0)),
    )
    return pl.pallas_call(
        _gather_row_bias_kernel,
        out_shape=jax.ShapeDtypeStruct((B, latent_dim), weight.dtype),
        grid_spec=grid_spec,
        compiler_params=pltpu.CompilerParams(dimension_semantics=("arbitrary",)),
    )(ids, weight, bias2d)


# ---------------------------------------------------------------------------
# Demo / smoke test
# ---------------------------------------------------------------------------
if __name__ == "__main__":
    key = jax.random.PRNGKey(0)
    k1, k2, k3, k4, k5 = jax.random.split(key, 5)

    # Small, module-consistent shapes.
    B = 8             # batch
    label_dim = 16    # one-hot label dimension
    latent_dim = 128  # latent dimension
    num_classes = 16

    # ---- one_hot=True (Linear) ----
    bound = 1.0 / jnp.sqrt(label_dim)
    weight = jax.random.uniform(k1, (label_dim, latent_dim), jnp.float32, -bound, bound)
    bias = jax.random.uniform(k2, (latent_dim,), jnp.float32, -bound, bound)
    classes = jax.random.randint(k3, (B,), 0, label_dim)
    labels_onehot = jax.nn.one_hot(classes, label_dim, dtype=jnp.float32)

    y_lin = label_mapping_linear(labels_onehot, weight, bias)
    jax.block_until_ready(y_lin)
    ref_lin = labels_onehot @ weight + bias
    assert jnp.allclose(y_lin, ref_lin, atol=1e-5), "linear path mismatch"

    # Fast path: same result via row gather + bias (no matmul, no one-hot).
    y_lin_fast = label_mapping_linear_from_ids(classes, weight, bias)
    jax.block_until_ready(y_lin_fast)
    assert jnp.allclose(y_lin_fast, ref_lin, atol=1e-5), "gather+bias fast path mismatch"

    # ---- one_hot=False (Embedding) ----
    table = jax.random.normal(k4, (num_classes, latent_dim), jnp.float32)
    ids = jax.random.randint(k5, (B,), 0, num_classes)

    y_emb = label_mapping_embedding(ids, table)
    jax.block_until_ready(y_emb)
    ref_emb = table[ids]
    assert jnp.allclose(y_emb, ref_emb), "embedding path mismatch"

    print("KERNEL_OK")
</pallas_src>

<mosaic_0001>
module attributes {stable_mosaic.version = 11 : i64} {
  func.func @_linear_kernel(%arg0: i32, %arg1: memref<8x16xf32, #tpu.memory_space<vmem>>, %arg2: memref<16x128xf32, #tpu.memory_space<vmem>>, %arg3: memref<1x128xf32, #tpu.memory_space<vmem>>, %arg4: memref<8x128xf32, #tpu.memory_space<vmem>>) attributes {dimension_semantics = [#tpu.dimension_semantics<parallel>], iteration_bounds = array<i64: 1>, scalar_prefetch = 0 : i64, scratch_operands = 0 : i64, tpu.core_type = #tpu.core_type<tc>, window_params = [{transform_indices = @transform_0, window_bounds = array<i64: 8, 16>}, {pipeline_mode = #tpu.pipeline_mode<synchronous>, transform_indices = @transform_1, window_bounds = array<i64: 16, 128>}, {pipeline_mode = #tpu.pipeline_mode<synchronous>, transform_indices = @transform_2, window_bounds = array<i64: 1, 128>}, {transform_indices = @transform_3, window_bounds = array<i64: 8, 128>}]} {
    %c0 = arith.constant 0 : index
    %c0_0 = arith.constant 0 : index
    %0 = vector.load %arg1[%c0, %c0_0] : memref<8x16xf32, #tpu.memory_space<vmem>>, vector<8x16xf32>
    %c0_1 = arith.constant 0 : index
    %c0_2 = arith.constant 0 : index
    %1 = vector.load %arg2[%c0_1, %c0_2] : memref<16x128xf32, #tpu.memory_space<vmem>>, vector<16x128xf32>
    %cst = arith.constant dense<0.000000e+00> : vector<8x128xf32>
    %2 = tpu.matmul %0, %1, %cst {dimension_numbers = #tpu.dot_dimension_numbers<[1], [0], [0], [1], [0, 0, 1, 1], [], []>} : vector<8x16xf32>, vector<16x128xf32>, vector<8x128xf32> -> vector<8x128xf32>
    %c0_3 = arith.constant 0 : index
    %c0_4 = arith.constant 0 : index
    %3 = vector.load %arg3[%c0_3, %c0_4] : memref<1x128xf32, #tpu.memory_space<vmem>>, vector<1x128xf32>
    %4 = vector.broadcast %3 : vector<1x128xf32> to vector<8x128xf32>
    %5 = arith.addf %2, %4 : vector<8x128xf32>
    %c0_5 = arith.constant 0 : index
    %c0_6 = arith.constant 0 : index
    %6 = vector.load %arg4[%c0_5, %c0_6] : memref<8x128xf32, #tpu.memory_space<vmem>>, vector<8x128xf32>
    tpu.vector_store %arg4[%c0_5, %c0_6], %5 {strides = array<i32>} : memref<8x128xf32, #tpu.memory_space<vmem>>, vector<8x128xf32>,
    return
  }
  func.func @transform_0(%arg0: i32) -> (i32, i32) {
    %c0_i32 = arith.constant 0 : i32
    %c0_i32_0 = arith.constant 0 : i32
    return %arg0, %c0_i32 : i32, i32
  }
  func.func @transform_1(%arg0: i32) -> (i32, i32) {
    %c0_i32 = arith.constant 0 : i32
    %c0_i32_0 = arith.constant 0 : i32
    %c0_i32_1 = arith.constant 0 : i32
    return %c0_i32, %c0_i32_0 : i32, i32
  }
  func.func @transform_2(%arg0: i32) -> (i32, i32) {
    %c0_i32 = arith.constant 0 : i32
    %c0_i32_0 = arith.constant 0 : i32
    %c0_i32_1 = arith.constant 0 : i32
    return %c0_i32, %c0_i32_0 : i32, i32
  }
  func.func @transform_3(%arg0: i32) -> (i32, i32) {
    %c0_i32 = arith.constant 0 : i32
    %c0_i32_0 = arith.constant 0 : i32
    return %arg0, %c0_i32 : i32, i32
  }
}

</mosaic_0001>

<bundles_post_ra>
// kernel: tpu_custom_call.1
= control target key start
LH: loop header
LB: loop body
LE: loop exit
PB: predicated region body
PF: predicated region fallthrough
CT: control target
= control target key end

     0   :  { %8 = vsyncpa [#allocation3], 0  ;;  %s311_s0 = inlined_call_operand.hbm [shape: f32[8,16], index: 0, kind: input, shape index: {}]   ;;  %s312_s1 = inlined_call_operand.hbm [shape: f32[16,128], index: 1, kind: input, shape index: {}]   ;;  %s313_s2 = inlined_call_operand.vmem [shape: f32[1,128], index: 2, kind: input, shape index: {}]   ;;  %s314_s3 = inlined_call_operand.hbm [shape: f32[8,128], index: 3, kind: output, shape index: {}]  }
   0x1   :  { %9 = vsyncpa [#allocation6], 0 }
   0x2   :  { %10 = vsyncpa [#allocation4], 0  ;;  %s237_s12 = smov [#allocation2]   ;;  %s238_s14 = smov [#allocation5]  }
   0x3   :  { %s17_s13 = sshll.u32 %s237_s12, 4  ;;  %s26_s15 = sshll.u32 %s238_s14, 4  ;;  %s18_s13 = int_to_ptr.vmem [resolvable:$true] %s17_s13  ;;  %s265_s15 = int_to_ptr.vmem [resolvable:$true] %s26_s15 }
   0x4   :  { %s165_s18 = scalar_lea.hbm %s311_s0, 128 }
   0x5   :  { %p166_p0 = scmp.ne.s32.totalorder %s311_s0, %s165_s18  ;;  %p169_p1 = scmp.lt.u32.totalorder %s165_s18, %s311_s0 }
   0x7   :  { %p171_p2 = pnand %p169_p1, %p166_p0 }
   0x9   :  { %174 = shalt.err (!%p171_p2)
}
   0xa   :  { %s175_s23 = scalar_lea.vmem %s18_s13, 128  ;;  %p180_p4 = scmp.lt.s32.totalorder %s18_s13, %s18_s13 }
   0xb   :  { %p176_p3 = scmp.ne.s32.totalorder %s18_s13, %s175_s23  ;;  %p181_p5 = scmp.lt.s32.totalorder %s175_s23, %s175_s23 }
   0xd   :  { %p182_p6 = por %p181_p5, %p180_p4 }
   0xf   :  { %p183_p7 = pnand %p182_p6, %p176_p3 }
  0x11   :  { %186 = shalt.err (!%p183_p7)
}
  0x12   :  { %20 = dma.hbm_to_vmem [thread:$0]  %s311_s0, 128, %s18_s13, [#allocation3]  }
  0x13   :  { %s187_s28 = scalar_lea.hbm %s312_s1, 256 }
  0x14   :  { %p188_p8 = scmp.ne.s32.totalorder %s312_s1, %s187_s28  ;;  %p191_p9 = scmp.lt.u32.totalorder %s187_s28, %s312_s1 }
  0x16   :  { %p193_p10 = pnand %p191_p9, %p188_p8 }
  0x18   :  { %196 = shalt.err (!%p193_p10)
}
  0x19   :  { %s197_s6 = scalar_lea.vmem %s265_s15, 256  ;;  %p202_p12 = scmp.lt.s32.totalorder %s265_s15, %s265_s15 }
  0x1a   :  { %p198_p11 = scmp.ne.s32.totalorder %s265_s15, %s197_s6  ;;  %p203_p13 = scmp.lt.s32.totalorder %s197_s6, %s197_s6 }
  0x1c   :  { %p204_p0 = por %p203_p13, %p202_p12 }
  0x1e   :  { %p205_p1 = pnand %p204_p0, %p198_p11 }
  0x20   :  { %208 = shalt.err (!%p205_p1)
}
  0x21   :  { %s239_s0 = smov 128   ;;  %s240_s7 = smov 8  }
  0x22   :  { %32 = dma.hbm_to_vmem [thread:$0]  %s312_s1, 256, %s265_s15, [#allocation6], %s239_s0, %s239_s0, %s240_s7  }
  0x23   :  { %231 = dma.done.wait [#allocation3], 128  }
  0x24   :  { %232 = vsyncadd [#allocation3], 4294967168 }
  0x25   :  { %233 = dma.done.wait [#allocation6], 256  }
  0x26   :  { %234 = vsyncadd [#allocation6], 4294967040  ;;  %v241_v0 = vmov 0.0|0.0   ;;  %vm242_vm0 = vmmov 0   ;;  %v243_v1 = vmov 0.0   ;;  %v42_v2 = vld [vmem:[#allocation5] sm:$0xff] }
  0x27   :  { %154 = vmatprep.subr.bf16.mxu0 %v241_v0  ;;  %151 = vmatprep.mubr.msk.f32.mxu0 %vm242_vm0, %v243_v1  ;;  %v43_v3 = vld [vmem:[#allocation5 + $0x8] sm:$0xff]  ;;  %v41_v5 = vld [vmem:[#allocation2] sm:$0xff]  ;;  %vm51_vm1 = vcmask 130048   ;;  %s244_s1 = smov [#allocation7]  }
  0x28   :  { %v155_v4 = vpack.c.bf16 %v43_v3, %v42_v2  ;;  %v142_v6 = vld [vmem:[%s313_s2] ss:$0 sm:$0xff]  ;;  %s132_s12 = sshll.u32 %s244_s1, 4  ;;  %s133_s12 = int_to_ptr.vmem [resolvable:$true] %s132_s12 }
  0x29   :  { %s209_s13 = scalar_lea.vmem %s133_s12, 128  ;;  %p214_p3 = scmp.lt.s32.totalorder %s133_s12, %s133_s12 }
  0x2a   :  { %156 = vmatpush3.bf16.msra.mxu0 %v155_v4  ;;  %p210_p2 = scmp.ne.s32.totalorder %s133_s12, %s209_s13  ;;  %p215_p4 = scmp.lt.s32.totalorder %s209_s13, %s209_s13 }
  0x2c   :  { %p216_p5 = por %p215_p4, %p214_p3 }
  0x2d   :  { %152 = vmatmul.mubr.msk.f32.vlgmr.msra.gmra.mrb[0].mxu0 %vm51_vm1, %v41_v5 }
  0x2e   :  { %p217_p6 = pnand %p216_p5, %p210_p2 }
 0x100   :  { %v121_v7 = vpop.f32.mrb[0].mxu0 }
 0x101   :  { %v122_v8 = vadd.f32 %v142_v6, %v121_v7  ;;  %v153_v9 = vpop.f32.mrb[1].mxu0 }
 0x103   :  { %125 = vst [vmem:[#allocation7] sm:$0xff] %v122_v8 }
 0x104   :  { %220 = shalt.err (!%p217_p6)
}
 0x105   :  { %s221_s16 = scalar_lea.hbm %s314_s3, 128 }
 0x106   :  { %p222_p7 = scmp.ne.s32.totalorder %s314_s3, %s221_s16  ;;  %p225_p8 = scmp.lt.u32.totalorder %s221_s16, %s314_s3 }
 0x108   :  { %p227_p9 = pnand %p225_p8, %p222_p7 }
 0x10a   :  { %230 = shalt.err (!%p227_p9)
}
 0x10b   :  { %135 = dma.vmem_to_hbm [thread:$0]  %s133_s12, 128, %s314_s3, [#allocation4]  }
 0x10c   :  { %235 = dma.done.wait [#allocation4], 128  }
 0x10d   :  { %236 = vsyncadd [#allocation4], 4294967168 }
 0x10e   :  { %139 = vsyncpa [#allocation3], 1 }
 0x10f   :  { %140 = vsyncpa [#allocation6], 1 }
 0x110   :  { %141 = vsyncpa [#allocation4], 1 }

</bundles_post_ra>
